<compile_context>
chip_gen: v5e
topology: v5e:2x2
jax: 0.10.0
libtpu: 0.0.40
codegen_flags: <defaults>
</compile_context>

<pallas_src>
import jax
import jax.numpy as jnp
from jax.experimental import pallas as pl
from jax.experimental.pallas import tpu as pltpu


def _round_up(n, m):
    return ((n + m - 1) // m) * m


def dqn_mlp_kernel(x_ref, w1_ref, b1_ref, w2_ref, b2_ref, w3_ref, b3_ref, o_ref):
    # Layer 1: (TB, 175) @ (175, 128).  x arrives f32 from HBM; cast on the VPU.
    x = x_ref[...].astype(jnp.bfloat16)
    h1 = jnp.dot(x, w1_ref[...], preferred_element_type=jnp.float32)
    h1 = jnp.maximum(h1 + b1_ref[...], 0.0)                       # f32 VPU math
    # Layer 2: (TB, 128) @ (128, 128) (cols 64..127 are zero padding).
    h2 = jnp.dot(h1.astype(jnp.bfloat16), w2_ref[...],
                 preferred_element_type=jnp.float32)
    h2 = jnp.maximum(h2 + b2_ref[...], 0.0)
    # Layer 3 (no activation): (TB, 128) @ (128, 4) -> narrow (TB, 4) store.
    out = jnp.dot(h2.astype(jnp.bfloat16), w3_ref[...],
                  preferred_element_type=jnp.float32)
    o_ref[...] = (out + b3_ref[...]).astype(o_ref.dtype)


def _choose_batch_tile(B, max_batch_tile):
    # Small batch: one block spanning the whole batch (block dim == array dim, so
    # it is always a legal block shape and there is no partial block at all).
    if B < 64:
        return max(B, 1)
    # Otherwise: at least 2 grid steps (v7x megacore + DMA/compute overlap) and
    # balanced tiles so batch padding waste stays below one tile; round to 16 for
    # bf16 (16, 128) sublane packing.
    n_tiles = max(2, pl.cdiv(B, max_batch_tile))
    return _round_up(pl.cdiv(B, n_tiles), 16)


def dqn_forward(x, kparams, *, max_batch_tile=2048):
    """x: (B, input_size) f32.  kparams: bf16 weights from prepare_kernel_params."""
    B, in_features = x.shape
    w1, b1 = kparams["W1"], kparams["b1"]
    w2, b2 = kparams["W2"], kparams["b2"]
    w3, b3 = kparams["W3"], kparams["b3"]
    K1, H1P = w1.shape          # (175, 128)  -- no K padding
    H2P, N = w3.shape           # (128, 4)    -- no output padding
    assert K1 == in_features

    TB = _choose_batch_tile(B, max_batch_tile)
    grid = (pl.cdiv(B, TB),)    # trailing block may be partial: OOB rows are
                                # unspecified on read and dropped on store (rows
                                # are independent -> safe).

    def resident(shape):        # same block every grid step -> stays VMEM-resident
        return pl.BlockSpec(shape, lambda i: (0, 0))

    flops = 2 * B * (K1 * H1P + H1P * H2P + H2P * N)
    bytes_accessed = (x.size * x.dtype.itemsize
                      + sum(int(a.size) * a.dtype.itemsize
                            for a in (w1, b1, w2, b2, w3, b3))
                      + B * N * 4)

    return pl.pallas_call(
        dqn_mlp_kernel,
        out_shape=jax.ShapeDtypeStruct((B, N), jnp.float32),
        grid=grid,
        in_specs=[
            pl.BlockSpec((TB, K1), lambda i: (i, 0)),   # x tile, pipelined over batch
            resident((K1, H1P)),                        # W1
            resident((1, H1P)),                         # b1
            resident((H1P, H2P)),                       # W2
            resident((1, H2P)),                         # b2
            resident((H2P, N)),                         # W3
            resident((1, N)),                           # b3
        ],
        out_specs=pl.BlockSpec((TB, N), lambda i: (i, 0)),
        compiler_params=pltpu.CompilerParams(
            dimension_semantics=("parallel",)),
        cost_estimate=pl.CostEstimate(
            flops=flops, transcendentals=0, bytes_accessed=bytes_accessed),
    )(x, w1, b1, w2, b2, w3, b3)


def init_dqn_params(key, input_size, hidden_sizes, output_size):
    """nn.Linear-style init (U[-1/sqrt(fan_in), 1/sqrt(fan_in)]).
    Weights stored (in_features, out_features) so the kernel computes x @ W + b."""
    dims = [input_size, hidden_sizes[0], hidden_sizes[1], output_size]
    params = {}
    for i in range(3):
        fan_in, fan_out = dims[i], dims[i + 1]
        key, kw, kb = jax.random.split(key, 3)
        bound = 1.0 / (fan_in ** 0.5)
        params[f"W{i+1}"] = jax.random.uniform(
            kw, (fan_in, fan_out), jnp.float32, -bound, bound)
        params[f"b{i+1}"] = jax.random.uniform(
            kb, (1, fan_out), jnp.float32, -bound, bound)
    return params


def prepare_kernel_params(params, input_size, hidden_sizes, output_size):
    """Cast weights to bf16.  Only the hidden dims are zero-padded to multiples of
    128 lanes; input features (175) and the Q-value output (4) keep their native
    sizes so no padded bytes for x or the output ever cross HBM.  Zero padding
    keeps the real outputs unchanged."""
    H1P = _round_up(hidden_sizes[0], 128)
    H2P = _round_up(hidden_sizes[1], 128)

    def pad2(a, shape):
        out = jnp.zeros(shape, a.dtype)
        return out.at[:a.shape[0], :a.shape[1]].set(a)

    return {
        "W1": pad2(params["W1"], (input_size, H1P)).astype(jnp.bfloat16),  # (175,128)
        "b1": pad2(params["b1"], (1, H1P)),                                # (1,128) f32
        "W2": pad2(params["W2"], (H1P, H2P)).astype(jnp.bfloat16),         # (128,128)
        "b2": pad2(params["b2"], (1, H2P)),                                # (1,128) f32
        "W3": pad2(params["W3"], (H2P, output_size)).astype(jnp.bfloat16), # (128,4)
        "b3": params["b3"],                                                # (1,4) f32
    }


if __name__ == "__main__":
    input_size = 175
    hidden_sizes = [128, 64]
    output_size = 4
    batch = 2

    key = jax.random.PRNGKey(0)
    key, kx = jax.random.split(key)
    x = jax.random.normal(kx, (batch, input_size), jnp.float32)

    params = init_dqn_params(key, input_size, hidden_sizes, output_size)
    kparams = prepare_kernel_params(params, input_size, hidden_sizes, output_size)

    out = dqn_forward(x, kparams)
    jax.block_until_ready(out)

    # Reference 1: bf16-faithful (same math as the kernel, pure JAX).
    def ref_bf16(xv, kp):
        xb = xv.astype(jnp.bfloat16).astype(jnp.float32)
        h = jnp.maximum(xb @ kp["W1"].astype(jnp.float32) + kp["b1"], 0.0)
        h = h.astype(jnp.bfloat16).astype(jnp.float32)
        h = jnp.maximum(h @ kp["W2"].astype(jnp.float32) + kp["b2"], 0.0)
        h = h.astype(jnp.bfloat16).astype(jnp.float32)
        return h @ kp["W3"].astype(jnp.float32) + kp["b3"]

    # Reference 2: original full-f32 module forward (loose tolerance for bf16 weights).
    def ref_f32(xv, p):
        h = jnp.maximum(xv @ p["W1"] + p["b1"], 0.0)
        h = jnp.maximum(h @ p["W2"] + p["b2"], 0.0)
        return h @ p["W3"] + p["b3"]

    expected = ref_bf16(x, kparams)
    expected_f32 = ref_f32(x, params)

    assert out.shape == (batch, output_size)
    assert jnp.allclose(out, expected, atol=2e-3, rtol=2e-3)
    assert jnp.allclose(out, expected_f32, atol=5e-2, rtol=5e-2)

    # Also exercise the multi-tile path (grid of 2 parallel batch tiles,
    # VMEM-resident weights reused across steps).
    batch2 = 96
    key, kx2 = jax.random.split(key)
    x2 = jax.random.normal(kx2, (batch2, input_size), jnp.float32)
    out2 = dqn_forward(x2, kparams)
    jax.block_until_ready(out2)
    assert out2.shape == (batch2, output_size)
    assert jnp.allclose(out2, ref_bf16(x2, kparams), atol=2e-3, rtol=2e-3)
    assert jnp.allclose(out2, ref_f32(x2, params), atol=5e-2, rtol=5e-2)

    print("KERNEL_OK")
</pallas_src>

<mosaic_0001>
module attributes {stable_mosaic.version = 11 : i64} {
  func.func @dqn_mlp_kernel(%arg0: i32, %arg1: memref<2x175xf32, #tpu.memory_space<vmem>>, %arg2: memref<175x128xbf16, #tpu.memory_space<vmem>>, %arg3: memref<1x128xf32, #tpu.memory_space<vmem>>, %arg4: memref<128x128xbf16, #tpu.memory_space<vmem>>, %arg5: memref<1x128xf32, #tpu.memory_space<vmem>>, %arg6: memref<128x4xbf16, #tpu.memory_space<vmem>>, %arg7: memref<1x4xf32, #tpu.memory_space<vmem>>, %arg8: memref<2x4xf32, #tpu.memory_space<vmem>>) attributes {dimension_semantics = [#tpu.dimension_semantics<parallel>], iteration_bounds = array<i64: 1>, scalar_prefetch = 0 : i64, scratch_operands = 0 : i64, tpu.core_type = #tpu.core_type<tc>, window_params = [{transform_indices = @transform_0, window_bounds = array<i64: 2, 175>}, {pipeline_mode = #tpu.pipeline_mode<synchronous>, transform_indices = @transform_1, window_bounds = array<i64: 175, 128>}, {pipeline_mode = #tpu.pipeline_mode<synchronous>, transform_indices = @transform_2, window_bounds = array<i64: 1, 128>}, {pipeline_mode = #tpu.pipeline_mode<synchronous>, transform_indices = @transform_3, window_bounds = array<i64: 128, 128>}, {pipeline_mode = #tpu.pipeline_mode<synchronous>, transform_indices = @transform_4, window_bounds = array<i64: 1, 128>}, {pipeline_mode = #tpu.pipeline_mode<synchronous>, transform_indices = @transform_5, window_bounds = array<i64: 128, 4>}, {pipeline_mode = #tpu.pipeline_mode<synchronous>, transform_indices = @transform_6, window_bounds = array<i64: 1, 4>}, {transform_indices = @transform_7, window_bounds = array<i64: 2, 4>}]} {
    %c0 = arith.constant 0 : index
    %c0_0 = arith.constant 0 : index
    %0 = vector.load %arg1[%c0, %c0_0] : memref<2x175xf32, #tpu.memory_space<vmem>>, vector<2x175xf32>
    %1 = arith.truncf %0 : vector<2x175xf32> to vector<2x175xbf16>
    %c0_1 = arith.constant 0 : index
    %c0_2 = arith.constant 0 : index
    %2 = vector.load %arg2[%c0_1, %c0_2] : memref<175x128xbf16, #tpu.memory_space<vmem>>, vector<175x128xbf16>
    %cst = arith.constant dense<0.000000e+00> : vector<2x128xf32>
    %3 = tpu.matmul %1, %2, %cst {dimension_numbers = #tpu.dot_dimension_numbers<[1], [0], [0], [1], [0, 0, 1, 1], [], []>} : vector<2x175xbf16>, vector<175x128xbf16>, vector<2x128xf32> -> vector<2x128xf32>
    %c0_3 = arith.constant 0 : index
    %c0_4 = arith.constant 0 : index
    %4 = vector.load %arg3[%c0_3, %c0_4] : memref<1x128xf32, #tpu.memory_space<vmem>>, vector<1x128xf32>
    %5 = vector.broadcast %4 : vector<1x128xf32> to vector<2x128xf32>
    %6 = arith.addf %3, %5 : vector<2x128xf32>
    %cst_5 = arith.constant 0.000000e+00 : f32
    %7 = vector.broadcast %cst_5 : f32 to vector<2x128xf32>
    %8 = arith.maximumf %6, %7 : vector<2x128xf32>
    %9 = arith.truncf %8 : vector<2x128xf32> to vector<2x128xbf16>
    %c0_6 = arith.constant 0 : index
    %c0_7 = arith.constant 0 : index
    %10 = vector.load %arg4[%c0_6, %c0_7] : memref<128x128xbf16, #tpu.memory_space<vmem>>, vector<128x128xbf16>
    %cst_8 = arith.constant dense<0.000000e+00> : vector<2x128xf32>
    %11 = tpu.matmul %9, %10, %cst_8 {dimension_numbers = #tpu.dot_dimension_numbers<[1], [0], [0], [1], [0, 0, 1, 1], [], []>} : vector<2x128xbf16>, vector<128x128xbf16>, vector<2x128xf32> -> vector<2x128xf32>
    %c0_9 = arith.constant 0 : index
    %c0_10 = arith.constant 0 : index
    %12 = vector.load %arg5[%c0_9, %c0_10] : memref<1x128xf32, #tpu.memory_space<vmem>>, vector<1x128xf32>
    %13 = vector.broadcast %12 : vector<1x128xf32> to vector<2x128xf32>
    %14 = arith.addf %11, %13 : vector<2x128xf32>
    %cst_11 = arith.constant 0.000000e+00 : f32
    %15 = vector.broadcast %cst_11 : f32 to vector<2x128xf32>
    %16 = arith.maximumf %14, %15 : vector<2x128xf32>
    %17 = arith.truncf %16 : vector<2x128xf32> to vector<2x128xbf16>
    %c0_12 = arith.constant 0 : index
    %c0_13 = arith.constant 0 : index
    %18 = vector.load %arg6[%c0_12, %c0_13] : memref<128x4xbf16, #tpu.memory_space<vmem>>, vector<128x4xbf16>
    %cst_14 = arith.constant dense<0.000000e+00> : vector<2x4xf32>
    %19 = tpu.matmul %17, %18, %cst_14 {dimension_numbers = #tpu.dot_dimension_numbers<[1], [0], [0], [1], [0, 0, 1, 1], [], []>} : vector<2x128xbf16>, vector<128x4xbf16>, vector<2x4xf32> -> vector<2x4xf32>
    %c0_15 = arith.constant 0 : index
    %c0_16 = arith.constant 0 : index
    %20 = vector.load %arg7[%c0_15, %c0_16] : memref<1x4xf32, #tpu.memory_space<vmem>>, vector<1x4xf32>
    %21 = vector.broadcast %20 : vector<1x4xf32> to vector<2x4xf32>
    %22 = arith.addf %19, %21 : vector<2x4xf32>
    %c0_17 = arith.constant 0 : index
    %c0_18 = arith.constant 0 : index
    %23 = vector.load %arg8[%c0_17, %c0_18] : memref<2x4xf32, #tpu.memory_space<vmem>>, vector<2x4xf32>
    tpu.vector_store %arg8[%c0_17, %c0_18], %22 {strides = array<i32>} : memref<2x4xf32, #tpu.memory_space<vmem>>, vector<2x4xf32>,
    return
  }
  func.func @transform_0(%arg0: i32) -> (i32, i32) {
    %c0_i32 = arith.constant 0 : i32
    %c0_i32_0 = arith.constant 0 : i32
    return %arg0, %c0_i32 : i32, i32
  }
  func.func @transform_1(%arg0: i32) -> (i32, i32) {
    %c0_i32 = arith.constant 0 : i32
    %c0_i32_0 = arith.constant 0 : i32
    %c0_i32_1 = arith.constant 0 : i32
    return %c0_i32, %c0_i32_0 : i32, i32
  }
  func.func @transform_2(%arg0: i32) -> (i32, i32) {
    %c0_i32 = arith.constant 0 : i32
    %c0_i32_0 = arith.constant 0 : i32
    %c0_i32_1 = arith.constant 0 : i32
    return %c0_i32, %c0_i32_0 : i32, i32
  }
  func.func @transform_3(%arg0: i32) -> (i32, i32) {
    %c0_i32 = arith.constant 0 : i32
    %c0_i32_0 = arith.constant 0 : i32
    %c0_i32_1 = arith.constant 0 : i32
    return %c0_i32, %c0_i32_0 : i32, i32
  }
  func.func @transform_4(%arg0: i32) -> (i32, i32) {
    %c0_i32 = arith.constant 0 : i32
    %c0_i32_0 = arith.constant 0 : i32
    %c0_i32_1 = arith.constant 0 : i32
    return %c0_i32, %c0_i32_0 : i32, i32
  }
  func.func @transform_5(%arg0: i32) -> (i32, i32) {
    %c0_i32 = arith.constant 0 : i32
    %c0_i32_0 = arith.constant 0 : i32
    %c0_i32_1 = arith.constant 0 : i32
    return %c0_i32, %c0_i32_0 : i32, i32
  }
  func.func @transform_6(%arg0: i32) -> (i32, i32) {
    %c0_i32 = arith.constant 0 : i32
    %c0_i32_0 = arith.constant 0 : i32
    %c0_i32_1 = arith.constant 0 : i32
    return %c0_i32, %c0_i32_0 : i32, i32
  }
  func.func @transform_7(%arg0: i32) -> (i32, i32) {
    %c0_i32 = arith.constant 0 : i32
    %c0_i32_0 = arith.constant 0 : i32
    return %arg0, %c0_i32 : i32, i32
  }
}

</mosaic_0001>

<bundles_post_ra>
// kernel: tpu_custom_call.1
= control target key start
LH: loop header
LB: loop body
LE: loop exit
PB: predicated region body
PF: predicated region fallthrough
CT: control target
= control target key end

     0   :  { %12 = vsyncpa [#allocation3], 0  ;;  %s755_s0 = inlined_call_operand.vmem [shape: f32[2,175], index: 0, kind: input, shape index: {}]   ;;  %s756_s1 = inlined_call_operand.hbm [shape: bf16[175,128], index: 1, kind: input, shape index: {}]   ;;  %s757_s2 = inlined_call_operand.hbm [shape: f32[1,128], index: 2, kind: input, shape index: {}]   ;;  %s758_s3 = inlined_call_operand.vmem [shape: bf16[128,128], index: 3, kind: input, shape index: {}]   ;;  %s759_s4 = inlined_call_operand.hbm [shape: f32[1,128], index: 4, kind: input, shape index: {}]   ;;  %s760_s5 = inlined_call_operand.vmem [shape: bf16[128,4], index: 5, kind: input, shape index: {}]   ;;  %s761_s6 = inlined_call_operand.vmem [shape: f32[1,4], index: 6, kind: input, shape index: {}]   ;;  %s762_s7 = inlined_call_operand.hbm [shape: f32[2,4], index: 7, kind: output, shape index: {}]  }
   0x1   :  { %13 = vsyncpa [#allocation6], 0  ;;  %s35_s26 = sshll.u32 %s757_s2, 4  ;;  %s36_s26 = int_to_ptr.hbm [resolvable:$true] %s35_s26 }
   0x2   :  { %14 = vsyncpa [#allocation4], 0  ;;  %s642_s27 = smov [#allocation5]   ;;  %s21_s8 = sshll.u32 %s756_s1, 4  ;;  %s22_s8 = int_to_ptr.hbm [resolvable:$true] %s21_s8 }
   0x3   :  { %s37_s28 = sshll.u32 %s642_s27, 4  ;;  %s643_s9 = smov [#allocation2]   ;;  %s38_s28 = int_to_ptr.vmem [resolvable:$true] %s37_s28 }
   0x4   :  { %40 = dma.hbm_to_vmem [thread:$0]  %s36_s26, 16, %s38_s28, [#allocation6]  }
   0x5   :  { %s23_s10 = sshll.u32 %s643_s9, 4  ;;  %s644_s11 = smov 64   ;;  %s24_s10 = int_to_ptr.vmem [resolvable:$true] %s23_s10 }
   0x6   :  { %s645_s12 = smov 4   ;;  %s48_s2 = sshll.u32 %s759_s4, 4  ;;  %s49_s2 = int_to_ptr.hbm [resolvable:$true] %s48_s2 }
   0x7   :  { %29 = dma.hbm_to_vmem [thread:$0]  %s22_s8, 1408, %s24_s10, [#allocation3], %s644_s11, %s644_s11, %s645_s12  }
   0x8   :  { %s646_s15 = smov [#allocation7]  }
   0x9   :  { %s50_s16 = sshll.u32 %s646_s15, 4  ;;  %s51_s16 = int_to_ptr.vmem [resolvable:$true] %s50_s16 }
   0xa   :  { %53 = dma.hbm_to_vmem [thread:$0]  %s49_s2, 16, %s51_s16, [#allocation6]  }
   0xb   :  { %636 = dma.done.wait [#allocation3], 1408  }
   0xc   :  { %637 = vsyncadd [#allocation3], 4294965888 }
   0xd   :  { %638 = dma.done.wait [#allocation6], 32  }
   0xe   :  { %639 = vsyncadd [#allocation6], 4294967264  ;;  %vm175_vm0 = vcmask 1046528   ;;  %vm176_vm1 = vcmask 1047552   ;;  %v647_v0 = vmov 65535   ;;  %v510_v2 = vld [vmem:[#allocation2 + $0x38] sm:$0xff] }
   0xf   :  { %v177_v1 = vsel %vm175_vm0, 4294967295, %v647_v0  ;;  %v513_v4 = vld [vmem:[#allocation2 + $0x50] sm:$0xff]  ;;  %182 = vmatpush.bf16.msra.mxu0 %v510_v2  ;;  %v71_v7 = vld [vmem:[%s755_s0] sm:$0xf]  ;;  %v512_v9 = vld [vmem:[#allocation2 + $0x48] sm:$0xff]  ;;  %vm171_vm2 = vcmask 384000  }
  0x10   :  { %v178_v3 = vsel %vm176_vm1, %v177_v1, 0  ;;  %v509_v5 = vld [vmem:[#allocation2 + $0x30] sm:$0xff]  ;;  %73 = vst [vmem:[#allocation1] ss:$4 sm:$0xff] %v71_v7  ;;  %v508_v10 = vld [vmem:[#allocation2 + $0x28] sm:$0xff]  ;;  %v511_v12 = vld [vmem:[#allocation2 + $0x40] sm:$0xff] }
  0x11   :  { %v180_v6 = vand.u32 %v513_v4, %v178_v3  ;;  %v521_v8 = vld [vmem:[%s758_s3 + $0x38] sm:$0xff]  ;;  %v520_v11 = vld [vmem:[%s758_s3 + $0x30] sm:$0xff]  ;;  %v507_v13 = vld [vmem:[#allocation2 + $0x20] sm:$0xff]  ;;  %s648_s22 = smov [#allocation8]   ;;  %s383_s26 = sshll.u32 %s762_s7, 4  ;;  %vm374_vm3 = vcmask 25600   ;;  %s384_s26 = int_to_ptr.hbm [resolvable:$true] %s383_s26 }
  0x12   :  { %278 = vmatpush.bf16.msra.mxu2 %v521_v8  ;;  %v519_v14 = vld [vmem:[%s758_s3 + $0x28] sm:$0xff]  ;;  %v506_v17 = vld [vmem:[#allocation2 + $0x18] sm:$0xff]  ;;  %v505_v19 = vld [vmem:[#allocation2 + $0x10] sm:$0xff]  ;;  %s381_s23 = sshll.u32 %s648_s22, 4  ;;  %s382_s23 = int_to_ptr.vmem [resolvable:$true] %s381_s23 }
  0x13   :  { %200 = vmatpush.bf16.msra.mxu1 %v180_v6  ;;  %183 = vmatpush.bf16.msra.mxu0 %v509_v5  ;;  %v518_v18 = vld [vmem:[%s758_s3 + $0x20] sm:$0xff]  ;;  %v504_v20 = vld [vmem:[#allocation2 + $0x8] sm:$0xff]  ;;  %v503_v21 = vld [vmem:[#allocation2] sm:$0xff] }
  0x14   :  { %v517_v24 = vld [vmem:[%s758_s3 + $0x18] sm:$0xff]  ;;  %v516_v25 = vld [vmem:[%s758_s3 + $0x10] sm:$0xff]  ;;  %v515_v26 = vld [vmem:[%s758_s3 + $0x8] sm:$0xff] }
  0x15   :  { %v514_v27 = vld [vmem:[%s758_s3] sm:$0xff]  ;;  %v529_v28 = vld [vmem:[%s760_s5 + $0x38] sm:$0xff]  ;;  %v528_v29 = vld [vmem:[%s760_s5 + $0x30] sm:$0xff] }
  0x16   :  { %279 = vmatpush.bf16.msra.mxu2 %v520_v11  ;;  %361 = vmatpush.bf16.msra.mxu3 %v529_v28  ;;  %v527_v31 = vld [vmem:[%s760_s5 + $0x28] sm:$0xff]  ;;  %v526_v32 = vld [vmem:[%s760_s5 + $0x20] sm:$0xff]  ;;  %v525_v34 = vld [vmem:[%s760_s5 + $0x18] sm:$0xff] }
  0x17   :  { %201 = vmatpush.bf16.msra.mxu1 %v512_v9  ;;  %184 = vmatpush.bf16.msra.mxu0 %v508_v10  ;;  %v75_v15 = vld.sshfl [vmem:[#allocation1 + $0x8] sm:$0xff pattern:$0x73625140]  ;;  %v74_v22 = vld.sshfl [vmem:[#allocation1] sm:$0xff pattern:$0x73625140] }
  0x18   :  { %v79_v16 = vpack.c.bf16 %v75_v15, %v75_v15  ;;  %v78_v23 = vpack.c.bf16 %v74_v22, %v74_v22  ;;  %v524_v35 = vld [vmem:[%s760_s5 + $0x10] sm:$0xff]  ;;  %v537_v36 = vld [vmem:[#allocation5] ss:$0 sm:$0xff]  ;;  %v523_v43 = vld [vmem:[%s760_s5 + $0x8] sm:$0xff] }
  0x19   :  { %v522_v44 = vld [vmem:[%s760_s5] sm:$0xff] }
  0x1a   :  { %280 = vmatpush.bf16.msra.mxu2 %v519_v14  ;;  %362 = vmatpush.bf16.msra.mxu3 %v528_v29  ;;  %v538_v45 = vld [vmem:[#allocation7] ss:$0 sm:$0xff]  ;;  %v539_v51 = vld [vmem:[%s761_s6] ss:$0 sm:$0xff] }
  0x1b   :  { %202 = vmatpush.bf16.msra.mxu1 %v511_v12  ;;  %185 = vmatpush.bf16.msra.mxu0 %v507_v13 }
  0x1e   :  { %438 = vmatmul.msk.bf16.vlgmr.msra.gmra.mxu1 %vm171_vm2, %v79_v16  ;;  %281 = vmatpush.bf16.msra.mxu2 %v518_v18 }
  0x1f   :  { %186 = vmatpush.bf16.msra.mxu0 %v506_v17  ;;  %363 = vmatpush.bf16.msra.mxu3 %v527_v31 }
  0x22   :  { %282 = vmatpush.bf16.msra.mxu2 %v517_v24 }
  0x23   :  { %187 = vmatpush.bf16.msra.mxu0 %v505_v19  ;;  %364 = vmatpush.bf16.msra.mxu3 %v526_v32 }
  0x26   :  { %283 = vmatpush.bf16.msra.mxu2 %v516_v25 }
  0x27   :  { %188 = vmatpush.bf16.msra.mxu0 %v504_v20  ;;  %365 = vmatpush.bf16.msra.mxu3 %v525_v34 }
  0x2a   :  { %284 = vmatpush.bf16.msra.mxu2 %v515_v26 }
  0x2b   :  { %189 = vmatpush.bf16.msra.mxu0 %v503_v21  ;;  %366 = vmatpush.bf16.msra.mxu3 %v524_v35 }
  0x2e   :  { %190 = vmatmul.bf16.vlgmr.msra.gmra.mxu0 %v78_v23  ;;  %285 = vmatpush.bf16.msra.mxu2 %v514_v27 }
  0x2f   :  { %367 = vmatpush.bf16.msra.mxu3 %v523_v43 }
  0x33   :  { %368 = vmatpush.bf16.msra.mxu3 %v522_v44 }
  0x9b   :  { %v204_v30 = vpop.f32.mrf.mxu1 }
  0xa3   :  { %v206_v33 = vpop.f32.mrf.mxu1 }
  0xab   :  { %v191_v37 = vpop.f32.mrf.mxu0 }
  0xac   :  { %v192_v38 = vadd.f32 %v537_v36, %v191_v37 }
  0xae   :  { %v205_v39 = vadd.f32 %v204_v30, %v192_v38 }
  0xb0   :  { %v208_v40 = vmax.f32 %v205_v39, 0.0 }
  0xb2   :  { %v209_v41 = vpack.c.bf16 %v208_v40, %v208_v40 }
  0xb3   :  { %v193_v42 = vpop.f32.mrf.mxu0 }
  0xb4   :  { %286 = vmatmul.bf16.vlgmr.msra.gmra.mxu2 %v209_v41 }
 0x137   :  { %v287_v46 = vpop.f32.mrf.mxu2 }
 0x138   :  { %v288_v47 = vadd.f32 %v538_v45, %v287_v46 }
 0x13a   :  { %v291_v48 = vmax.f32 %v288_v47, 0.0 }
 0x13c   :  { %v292_v49 = vpack.c.bf16 %v291_v48, %v291_v48 }
 0x13e   :  { %369 = vmatmul.bf16.vlgmr.msra.gmra.mxu3 %v292_v49 }
 0x13f   :  { %v289_v50 = vpop.f32.mrf.mxu2 }
 0x1c1   :  { %v370_v52 = vpop.f32.mrf.mxu3 }
 0x1c2   :  { %v371_v53 = vadd.f32 %v539_v51, %v370_v52 }
 0x1c4   :  { %375 = vst.msk [vmem:[#allocation8] sm:$0x3] %vm374_vm3, %v371_v53 }
 0x1c5   :  { %386 = dma.vmem_to_hbm [thread:$0]  %s382_s23, 32, %s384_s26, [#allocation4]  }
 0x1c9   :  { %v372_v54 = vpop.f32.mrf.mxu3 }
 0x1ca   :  { %640 = dma.done.wait [#allocation4], 32  }
 0x1cb   :  { %641 = vsyncadd [#allocation4], 4294967264 }
 0x1cc   :  { %391 = vsyncpa [#allocation3], 1 }
 0x1cd   :  { %392 = vsyncpa [#allocation6], 1 }
 0x1ce   :  { %393 = vsyncpa [#allocation4], 1 }

</bundles_post_ra>
